<compile_context>
chip_gen: v7x
topology: tpu7x:2x2x1
jax: 0.10.0
libtpu: 0.0.40
codegen_flags: <defaults>
</compile_context>

<pallas_src>
import math
import functools

import jax
import jax.numpy as jnp
from jax.experimental import pallas as pl
from jax.experimental.pallas import tpu as pltpu


NEG_BIG = -1e30  # large-but-safe fill value (stays finite after max-subtraction)


# ------------------------------ Pallas kernel ------------------------------

def _flash_attn_kernel(*refs, scale, has_mask, mask_per_batch):
    """One grid step = one (batch, head, q-tile, kv-tile).

    refs (has_mask=True):  q, k, v, m, o, m_sc, l_sc, acc_sc
    refs (has_mask=False): q, k, v, o, m_sc, l_sc, acc_sc
      q: (1, 1, tq, dk)    k, v: (1, 1, tk, dk)
      m: (tq, tk) int32 (shared) or (1, tq, tk) int32 (per batch)
      o: (1, 1, tq, dk)
      scratch: m_sc/l_sc (tq, 1) f32, acc_sc (tq, dk) f32
    """
    if has_mask:
        q_ref, k_ref, v_ref, m_ref, o_ref, m_sc, l_sc, acc_sc = refs
    else:
        q_ref, k_ref, v_ref, o_ref, m_sc, l_sc, acc_sc = refs

    ki = pl.program_id(3)

    @pl.when(ki == 0)
    def _init():
        m_sc[...] = jnp.full_like(m_sc, -jnp.inf)
        l_sc[...] = jnp.zeros_like(l_sc)
        acc_sc[...] = jnp.zeros_like(acc_sc)

    # Fold 1/sqrt(dk) into the Q tile (f32 scale, then bf16 for the MXU).
    q = (q_ref[0, 0].astype(jnp.float32) * scale).astype(jnp.bfloat16)  # (tq,dk)
    k = k_ref[0, 0].astype(jnp.bfloat16)                                # (tk,dk)
    v = v_ref[0, 0].astype(jnp.bfloat16)                                # (tk,dk)

    # Q K^T: contract last dims (no explicit transpose), f32 accumulation.
    s = jax.lax.dot_general(
        q, k, (((1,), (1,)), ((), ())),
        preferred_element_type=jnp.float32)                             # (tq,tk)

    if has_mask:
        m = m_ref[0] if mask_per_batch else m_ref[...]                  # (tq,tk)
        s = jnp.where(m != 0, s, NEG_BIG)

    # Online softmax (all f32).
    m_prev = m_sc[...]                                                  # (tq,1)
    m_new = jnp.maximum(m_prev, jnp.max(s, axis=-1, keepdims=True))
    alpha = jnp.exp(m_prev - m_new)                                     # (tq,1)
    p = jnp.exp(s - m_new)                                              # (tq,tk)

    l_sc[...] = alpha * l_sc[...] + jnp.sum(p, axis=-1, keepdims=True)
    acc_sc[...] = alpha * acc_sc[...] + jnp.dot(
        p.astype(jnp.bfloat16), v, preferred_element_type=jnp.float32)
    m_sc[...] = m_new

    # TODO(synk): dropout on the attention probabilities is identity here.

    @pl.when(ki == pl.num_programs(3) - 1)
    def _finalize():
        inv_l = pl.reciprocal(l_sc[...], approx=True)
        o_ref[0, 0] = (acc_sc[...] * inv_l).astype(o_ref.dtype)


# --------------------------------- wrapper ---------------------------------

def attention(Q, K, V, mask=None, *, block_q=256, block_k=256):
    """Scaled dot-product attention (matches the PyTorch `Attention` module).

    Q: (B, H, Sq, dk), K/V: (B, H, Sk, dk).
    mask: optional boolean, shape (Sq, Sk), (B, Sq, Sk) or (B, 1, Sq, Sk);
          True = attend. Per-head masks are not supported (raises).
    Returns (B, H, Sq, dk) in Q's dtype.

    block_q / block_k: q- and kv-tile sizes. Defaults (256) suit v6e/v7x MXUs;
    use 128 on v5e. They are clamped to Sq / Sk for small inputs.
    """
    B, H, Sq, dk = Q.shape
    Sk = K.shape[2]
    scale = 1.0 / math.sqrt(dk)

    tq = min(block_q, Sq)
    tk = min(block_k, Sk)
    # TODO(synk): ragged sequence lengths would need padding; require exact tiling.
    assert Sq % tq == 0 and Sk % tk == 0, (Sq, tq, Sk, tk)

    grid = (B, H, Sq // tq, Sk // tk)

    in_specs = [
        pl.BlockSpec((1, 1, tq, dk), lambda b, h, qi, ki: (b, h, qi, 0)),
        pl.BlockSpec((1, 1, tk, dk), lambda b, h, qi, ki: (b, h, ki, 0)),
        pl.BlockSpec((1, 1, tk, dk), lambda b, h, qi, ki: (b, h, ki, 0)),
    ]
    args = [Q, K, V]

    has_mask = mask is not None
    mask_per_batch = False
    if has_mask:
        m = jnp.asarray(mask)
        if m.ndim == 4:
            if m.shape[1] != 1:
                raise ValueError("per-head masks are not supported")
            m = m[:, 0]
        if m.ndim == 3 and m.shape[0] == 1:
            m = m[0]
        if m.ndim == 2:
            # Single (Sq, Sk) mask shared across batch and heads: no HBM
            # broadcast, every grid step indexes the same array.
            m = m.astype(jnp.int32)
            in_specs.append(
                pl.BlockSpec((tq, tk), lambda b, h, qi, ki: (qi, ki)))
        elif m.ndim == 3:
            if m.shape[0] != B:
                raise ValueError(f"mask batch dim {m.shape[0]} != {B}")
            mask_per_batch = True
            m = m.astype(jnp.int32)
            in_specs.append(
                pl.BlockSpec((1, tq, tk), lambda b, h, qi, ki: (b, qi, ki)))
        else:
            raise ValueError(f"unsupported mask rank {m.ndim}")
        args.append(m)

    kern = functools.partial(
        _flash_attn_kernel, scale=scale,
        has_mask=has_mask, mask_per_batch=mask_per_batch)

    return pl.pallas_call(
        kern,
        out_shape=jax.ShapeDtypeStruct((B, H, Sq, dk), Q.dtype),
        grid=grid,
        in_specs=in_specs,
        out_specs=pl.BlockSpec((1, 1, tq, dk), lambda b, h, qi, ki: (b, h, qi, 0)),
        scratch_shapes=[
            pltpu.VMEM((tq, 1), jnp.float32),   # running max
            pltpu.VMEM((tq, 1), jnp.float32),   # running sum
            pltpu.VMEM((tq, dk), jnp.float32),  # output accumulator
        ],
        compiler_params=pltpu.CompilerParams(
            dimension_semantics=("parallel", "parallel", "parallel", "arbitrary")),
    )(*args)


# --------------------------------- reference --------------------------------

def _attention_ref(Q, K, V, mask):
    """Pure-JAX reference with the same bf16-matmul / f32-accum precision."""
    dk = Q.shape[-1]
    s = jnp.einsum(
        "bhqd,bhkd->bhqk",
        Q.astype(jnp.bfloat16), K.astype(jnp.bfloat16),
        preferred_element_type=jnp.float32,
    ) / math.sqrt(dk)
    if mask is not None:
        m = jnp.asarray(mask)
        if m.ndim == 2:
            m = m[None, None]
        elif m.ndim == 3:
            m = m[:, None]
        s = jnp.where(m, s, NEG_BIG)
    p = jax.nn.softmax(s, axis=-1)
    return jnp.einsum(
        "bhqk,bhkd->bhqd",
        p.astype(jnp.bfloat16), V.astype(jnp.bfloat16),
        preferred_element_type=jnp.float32,
    )


# ----------------------------------- main -----------------------------------

if __name__ == "__main__":
    B, H, Sq, Sk, dk = 2, 4, 8, 8, 32

    key = jax.random.PRNGKey(0)
    kq, kk, kv = jax.random.split(key, 3)
    Q = jax.random.normal(kq, (B, H, Sq, dk), jnp.float32)
    K = jax.random.normal(kk, (B, H, Sk, dk), jnp.float32)
    V = jax.random.normal(kv, (B, H, Sk, dk), jnp.float32)

    # Causal mask (True = attend).
    causal2d = jnp.tril(jnp.ones((Sq, Sk), dtype=bool))          # shared
    causal3d = jnp.broadcast_to(causal2d[None], (B, Sq, Sk))     # per-batch

    attn = jax.jit(attention)

    cases = [
        (jax.block_until_ready(attn(Q, K, V, causal2d)), causal2d),
        (jax.block_until_ready(attn(Q, K, V, causal3d)), causal3d),
        (jax.block_until_ready(attn(Q, K, V, None)), None),
    ]

    for out, m in cases:
        assert out.shape == (B, H, Sq, dk), out.shape
        assert bool(jnp.all(jnp.isfinite(out)))
        ref = _attention_ref(Q, K, V, m)
        err = float(jnp.max(jnp.abs(out - ref)))
        assert err < 5e-2, f"max abs error {err}"

    print("KERNEL_OK")
</pallas_src>

<mosaic_0001>
module attributes {stable_mosaic.version = 11 : i64} {
  func.func @_flash_attn_kernel(%arg0: i32, %arg1: i32, %arg2: i32, %arg3: i32, %arg4: memref<1x1x8x32xf32, #tpu.memory_space<vmem>>, %arg5: memref<1x1x8x32xf32, #tpu.memory_space<vmem>>, %arg6: memref<1x1x8x32xf32, #tpu.memory_space<vmem>>, %arg7: memref<8x8xi32, #tpu.memory_space<vmem>>, %arg8: memref<1x1x8x32xf32, #tpu.memory_space<vmem>>, %arg9: memref<8x1xf32, #tpu.memory_space<vmem>>, %arg10: memref<8x1xf32, #tpu.memory_space<vmem>>, %arg11: memref<8x32xf32, #tpu.memory_space<vmem>>) attributes {dimension_semantics = [#tpu.dimension_semantics<parallel>, #tpu.dimension_semantics<parallel>, #tpu.dimension_semantics<parallel>, #tpu.dimension_semantics<arbitrary>], iteration_bounds = array<i64: 2, 4, 1, 1>, scalar_prefetch = 0 : i64, scratch_operands = 3 : i64, tpu.core_type = #tpu.core_type<tc>, window_params = [{transform_indices = @transform_0, window_bounds = array<i64: 1, 1, 8, 32>}, {transform_indices = @transform_1, window_bounds = array<i64: 1, 1, 8, 32>}, {transform_indices = @transform_2, window_bounds = array<i64: 1, 1, 8, 32>}, {transform_indices = @transform_3, window_bounds = array<i64: 8, 8>}, {transform_indices = @transform_4, window_bounds = array<i64: 1, 1, 8, 32>}]} {
    %c0_i32 = arith.constant 0 : i32
    %0 = arith.cmpi eq, %arg3, %c0_i32 : i32
    %1 = arith.extui %0 : i1 to i32
    %c0_i32_0 = arith.constant 0 : i32
    %2 = arith.cmpi ne, %1, %c0_i32_0 : i32
    scf.if %2 {
      %cst_34 = arith.constant 0xFF800000 : f32
      %46 = vector.broadcast %cst_34 : f32 to vector<8x1xf32>
      %c0_35 = arith.constant 0 : index
      %c0_36 = arith.constant 0 : index
      %47 = vector.load %arg9[%c0_35, %c0_36] : memref<8x1xf32, #tpu.memory_space<vmem>>, vector<8x1xf32>
      tpu.vector_store %arg9[%c0_35, %c0_36], %46 {strides = array<i32>} : memref<8x1xf32, #tpu.memory_space<vmem>>, vector<8x1xf32>,
      %cst_37 = arith.constant 0.000000e+00 : f32
      %48 = vector.broadcast %cst_37 : f32 to vector<8x1xf32>
      %c0_38 = arith.constant 0 : index
      %c0_39 = arith.constant 0 : index
      %49 = vector.load %arg10[%c0_38, %c0_39] : memref<8x1xf32, #tpu.memory_space<vmem>>, vector<8x1xf32>
      tpu.vector_store %arg10[%c0_38, %c0_39], %48 {strides = array<i32>} : memref<8x1xf32, #tpu.memory_space<vmem>>, vector<8x1xf32>,
      %cst_40 = arith.constant 0.000000e+00 : f32
      %50 = vector.broadcast %cst_40 : f32 to vector<8x32xf32>
      %c0_41 = arith.constant 0 : index
      %c0_42 = arith.constant 0 : index
      %51 = vector.load %arg11[%c0_41, %c0_42] : memref<8x32xf32, #tpu.memory_space<vmem>>, vector<8x32xf32>
      tpu.vector_store %arg11[%c0_41, %c0_42], %50 {strides = array<i32>} : memref<8x32xf32, #tpu.memory_space<vmem>>, vector<8x32xf32>,
    } else {
    }
    %c0 = arith.constant 0 : index
    %c0_1 = arith.constant 0 : index
    %c0_2 = arith.constant 0 : index
    %c0_3 = arith.constant 0 : index
    %3 = vector.load %arg4[%c0, %c0_1, %c0_2, %c0_3] : memref<1x1x8x32xf32, #tpu.memory_space<vmem>>, vector<1x1x8x32xf32>
    %4 = vector.shape_cast %3 : vector<1x1x8x32xf32> to vector<8x32xf32>
    %cst = arith.constant 0.176776692 : f32
    %5 = vector.broadcast %cst : f32 to vector<8x32xf32>
    %6 = arith.mulf %4, %5 : vector<8x32xf32>
    %7 = arith.truncf %6 : vector<8x32xf32> to vector<8x32xbf16>
    %c0_4 = arith.constant 0 : index
    %c0_5 = arith.constant 0 : index
    %c0_6 = arith.constant 0 : index
    %c0_7 = arith.constant 0 : index
    %8 = vector.load %arg5[%c0_4, %c0_5, %c0_6, %c0_7] : memref<1x1x8x32xf32, #tpu.memory_space<vmem>>, vector<1x1x8x32xf32>
    %9 = vector.shape_cast %8 : vector<1x1x8x32xf32> to vector<8x32xf32>
    %10 = arith.truncf %9 : vector<8x32xf32> to vector<8x32xbf16>
    %c0_8 = arith.constant 0 : index
    %c0_9 = arith.constant 0 : index
    %c0_10 = arith.constant 0 : index
    %c0_11 = arith.constant 0 : index
    %11 = vector.load %arg6[%c0_8, %c0_9, %c0_10, %c0_11] : memref<1x1x8x32xf32, #tpu.memory_space<vmem>>, vector<1x1x8x32xf32>
    %12 = vector.shape_cast %11 : vector<1x1x8x32xf32> to vector<8x32xf32>
    %13 = arith.truncf %12 : vector<8x32xf32> to vector<8x32xbf16>
    %cst_12 = arith.constant dense<0.000000e+00> : vector<8x8xf32>
    %14 = tpu.matmul %7, %10, %cst_12 {dimension_numbers = #tpu.dot_dimension_numbers<[1], [1], [0], [0], [0, 0, 1, 0], [], []>} : vector<8x32xbf16>, vector<8x32xbf16>, vector<8x8xf32> -> vector<8x8xf32>
    %c0_13 = arith.constant 0 : index
    %c0_14 = arith.constant 0 : index
    %15 = vector.load %arg7[%c0_13, %c0_14] : memref<8x8xi32, #tpu.memory_space<vmem>>, vector<8x8xi32>
    %c0_i32_15 = arith.constant 0 : i32
    %16 = vector.broadcast %c0_i32_15 : i32 to vector<8x8xi32>
    %17 = arith.cmpi ne, %15, %16 : vector<8x8xi32>
    %cst_16 = arith.constant -1.000000e+30 : f32
    %18 = vector.broadcast %cst_16 : f32 to vector<8x8xf32>
    %19 = arith.select %17, %14, %18 : vector<8x8xi1>, vector<8x8xf32>
    %c0_17 = arith.constant 0 : index
    %c0_18 = arith.constant 0 : index
    %20 = vector.load %arg9[%c0_17, %c0_18] : memref<8x1xf32, #tpu.memory_space<vmem>>, vector<8x1xf32>
    %cst_19 = arith.constant dense<0xFF800000> : vector<8xf32>
    %21 = vector.multi_reduction <maximumf>, %19, %cst_19 [1] : vector<8x8xf32> to vector<8xf32>
    %22 = vector.shape_cast %21 : vector<8xf32> to vector<8x1xf32>
    %23 = arith.maximumf %20, %22 : vector<8x1xf32>
    %24 = arith.subf %20, %23 : vector<8x1xf32>
    %25 = math.exp %24 : vector<8x1xf32>
    %26 = vector.broadcast %23 : vector<8x1xf32> to vector<8x8xf32>
    %27 = arith.subf %19, %26 : vector<8x8xf32>
    %28 = math.exp %27 : vector<8x8xf32>
    %c0_20 = arith.constant 0 : index
    %c0_21 = arith.constant 0 : index
    %29 = vector.load %arg10[%c0_20, %c0_21] : memref<8x1xf32, #tpu.memory_space<vmem>>, vector<8x1xf32>
    %30 = arith.mulf %25, %29 : vector<8x1xf32>
    %cst_22 = arith.constant dense<0.000000e+00> : vector<8xf32>
    %31 = vector.multi_reduction <add>, %28, %cst_22 [1] : vector<8x8xf32> to vector<8xf32>
    %32 = vector.shape_cast %31 : vector<8xf32> to vector<8x1xf32>
    %33 = arith.addf %30, %32 : vector<8x1xf32>
    %c0_23 = arith.constant 0 : index
    %c0_24 = arith.constant 0 : index
    %34 = vector.load %arg10[%c0_23, %c0_24] : memref<8x1xf32, #tpu.memory_space<vmem>>, vector<8x1xf32>
    tpu.vector_store %arg10[%c0_23, %c0_24], %33 {strides = array<i32>} : memref<8x1xf32, #tpu.memory_space<vmem>>, vector<8x1xf32>,
    %c0_25 = arith.constant 0 : index
    %c0_26 = arith.constant 0 : index
    %35 = vector.load %arg11[%c0_25, %c0_26] : memref<8x32xf32, #tpu.memory_space<vmem>>, vector<8x32xf32>
    %36 = vector.broadcast %25 : vector<8x1xf32> to vector<8x32xf32>
    %37 = arith.mulf %36, %35 : vector<8x32xf32>
    %38 = arith.truncf %28 : vector<8x8xf32> to vector<8x8xbf16>
    %cst_27 = arith.constant dense<0.000000e+00> : vector<8x32xf32>
    %39 = tpu.matmul %38, %13, %cst_27 {dimension_numbers = #tpu.dot_dimension_numbers<[1], [0], [0], [1], [0, 0, 1, 1], [], []>} : vector<8x8xbf16>, vector<8x32xbf16>, vector<8x32xf32> -> vector<8x32xf32>
    %40 = arith.addf %37, %39 : vector<8x32xf32>
    %c0_28 = arith.constant 0 : index
    %c0_29 = arith.constant 0 : index
    %41 = vector.load %arg11[%c0_28, %c0_29] : memref<8x32xf32, #tpu.memory_space<vmem>>, vector<8x32xf32>
    tpu.vector_store %arg11[%c0_28, %c0_29], %40 {strides = array<i32>} : memref<8x32xf32, #tpu.memory_space<vmem>>, vector<8x32xf32>,
    %c0_30 = arith.constant 0 : index
    %c0_31 = arith.constant 0 : index
    %42 = vector.load %arg9[%c0_30, %c0_31] : memref<8x1xf32, #tpu.memory_space<vmem>>, vector<8x1xf32>
    tpu.vector_store %arg9[%c0_30, %c0_31], %23 {strides = array<i32>} : memref<8x1xf32, #tpu.memory_space<vmem>>, vector<8x1xf32>,
    %c0_i32_32 = arith.constant 0 : i32
    %43 = arith.cmpi eq, %arg3, %c0_i32_32 : i32
    %44 = arith.extui %43 : i1 to i32
    %c0_i32_33 = arith.constant 0 : i32
    %45 = arith.cmpi ne, %44, %c0_i32_33 : i32
    scf.if %45 {
      %c0_34 = arith.constant 0 : index
      %c0_35 = arith.constant 0 : index
      %46 = vector.load %arg10[%c0_34, %c0_35] : memref<8x1xf32, #tpu.memory_space<vmem>>, vector<8x1xf32>
      %47 = tpu.reciprocal %46 {approx = true} : vector<8x1xf32> -> vector<8x1xf32>
      %c0_36 = arith.constant 0 : index
      %c0_37 = arith.constant 0 : index
      %48 = vector.load %arg11[%c0_36, %c0_37] : memref<8x32xf32, #tpu.memory_space<vmem>>, vector<8x32xf32>
      %49 = vector.broadcast %47 : vector<8x1xf32> to vector<8x32xf32>
      %50 = arith.mulf %48, %49 : vector<8x32xf32>
      %c0_38 = arith.constant 0 : index
      %c0_39 = arith.constant 0 : index
      %c0_40 = arith.constant 0 : index
      %c0_41 = arith.constant 0 : index
      %51 = vector.load %arg8[%c0_38, %c0_39, %c0_40, %c0_41] : memref<1x1x8x32xf32, #tpu.memory_space<vmem>>, vector<1x1x8x32xf32>
      %52 = vector.shape_cast %51 : vector<1x1x8x32xf32> to vector<8x32xf32>
      %53 = vector.shape_cast %50 : vector<8x32xf32> to vector<1x1x8x32xf32>
      tpu.vector_store %arg8[%c0_38, %c0_39, %c0_40, %c0_41], %53 {strides = array<i32>} : memref<1x1x8x32xf32, #tpu.memory_space<vmem>>, vector<1x1x8x32xf32>,
    } else {
    }
    return
  }
  func.func @transform_0(%arg0: i32, %arg1: i32, %arg2: i32, %arg3: i32) -> (i32, i32, i32, i32) {
    %c0_i32 = arith.constant 0 : i32
    %c0_i32_0 = arith.constant 0 : i32
    return %arg0, %arg1, %arg2, %c0_i32 : i32, i32, i32, i32
  }
  func.func @transform_1(%arg0: i32, %arg1: i32, %arg2: i32, %arg3: i32) -> (i32, i32, i32, i32) {
    %c0_i32 = arith.constant 0 : i32
    %c0_i32_0 = arith.constant 0 : i32
    return %arg0, %arg1, %arg3, %c0_i32 : i32, i32, i32, i32
  }
  func.func @transform_2(%arg0: i32, %arg1: i32, %arg2: i32, %arg3: i32) -> (i32, i32, i32, i32) {
    %c0_i32 = arith.constant 0 : i32
    %c0_i32_0 = arith.constant 0 : i32
    return %arg0, %arg1, %arg3, %c0_i32 : i32, i32, i32, i32
  }
  func.func @transform_3(%arg0: i32, %arg1: i32, %arg2: i32, %arg3: i32) -> (i32, i32) {
    %c0_i32 = arith.constant 0 : i32
    return %arg2, %arg3 : i32, i32
  }
  func.func @transform_4(%arg0: i32, %arg1: i32, %arg2: i32, %arg3: i32) -> (i32, i32, i32, i32) {
    %c0_i32 = arith.constant 0 : i32
    %c0_i32_0 = arith.constant 0 : i32
    return %arg0, %arg1, %arg2, %c0_i32 : i32, i32, i32, i32
  }
}

</mosaic_0001>

<bundles_post_ra>
// kernel: attention.1
= control target key start
LH: loop header
LB: loop body
LE: loop exit
PB: predicated region body
PF: predicated region fallthrough
CT: control target
= control target key end

     0   :  { %s1373_s0 = inlined_call_operand.hbm [shape: f32[2,4,8,32], index: 0, kind: input, shape index: {}]   ;;  %s1374_s1 = inlined_call_operand.hbm [shape: f32[2,4,8,32], index: 1, kind: input, shape index: {}]   ;;  %s1375_s2 = inlined_call_operand.hbm [shape: f32[2,4,8,32], index: 2, kind: input, shape index: {}]   ;;  %s1376_s3 = inlined_call_operand.vmem [shape: s32[8,8], index: 3, kind: input, shape index: {}]   ;;  %s1377_s4 = inlined_call_operand.hbm [shape: f32[2,4,8,32], index: 4, kind: output, shape index: {}]  }
   0x1   :  { %1388 = sst [smem:[#allocation22_spill]] %s1374_s1 }
   0x2   :  { %9 = vsyncpa [#allocation6], 0 }
   0x3   :  { %11 = vsyncpa [#allocation6 + $0x1], 0 }
   0x4   :  { %12 = vsyncpa [#allocation9], 0 }
   0x5   :  { %14 = vsyncpa [#allocation9 + $0x1], 0 }
   0x6   :  { %15 = vsyncpa [#allocation7], 0 }
   0x7   :  { %17 = vsyncpa [#allocation7 + $0x1], 0  ;;  %s1072_s15 = smov 0   ;;  %s1074_s16 = smov 0  }
   0x8   :  { %s1076_s17 = smov 0   ;;  %s1078_s18 = smov 0  }
   0x9   :  { %s1080_s19 = smov 0   ;;  %s1082_s20 = smov 0  }
   0xa   :  { %s1084_s21 = smov 0   ;;  %s1086_s22 = smov 0  }
   0xb LB: > { %1389 = sst [smem:[#allocation15_spill]] %s1009_s15  ;;  %s1113_s23 = sadd.s32 4294967295, %s1037_s22   ;;  %s1037_s22 = sphi %s1086_s22, %s23_s22   ;;  %s1033_s21 = sphi %s1084_s21, %s1418_s21   ;;  %s1029_s20 = sphi %s1082_s20, %s1417_s20   ;;  %s1025_s19 = sphi %s1080_s19, %s1416_s19   ;;  %s1021_s18 = sphi %s1078_s18, %s1415_s18   ;;  %s1017_s17 = sphi %s1076_s17, %s1421_s17   ;;  %s1013_s16 = sphi %s1074_s16, %s1420_s16   ;;  %s1009_s15 = sphi %s1072_s15, %s1419_s15  }
   0xc   : > { %1390 = sst [smem:[#allocation16_spill]] %s1029_s20  ;;  %s704_s24 = sadd.s32 4294967294, %s1037_s22  }
   0xd   : > { %1391 = sst [smem:[#allocation17_spill]] %s1033_s21  ;;  %s45_s25 = sadd.s32 1, %s1029_s20 }
   0xe   : > { %s49_s26 = sadd.s32 1, %s1033_s21  ;;  %p47_p0 = scmp.ge.s32.totalorder %s45_s25, 4 }
   0xf   : > { %s60_s27 = sadd.s32 1, %s1017_s17  ;;  %p67_p1 = scmp.ne.s32.totalorder %s1017_s17, %s1013_s16 }
  0x10   : > { %p68_p2 = scmp.eq.s32.totalorder %s1037_s22, 0  ;;  %s1423_s25 = smov (%p47_p0, %s45_s25), 0 }
  0x11   : > { %1392 = sst [smem:[#allocation18_spill]] %s1423_s25  ;;  %s1425_s26 = smov (!%p47_p0, %s49_s26), %s1033_s21 }
  0x12   : > { %s54_s28 = ssub.s32 %s1029_s20, %s1423_s25  ;;  %p1127_p3 = por %p68_p2, %p67_p1 }
  0x13   : > { %p51_p4 = scmp.ge.s32.totalorder %s1425_s26, 2  ;;  %p73_p5 = scmp.ne.s32.totalorder %s1013_s16, %s1009_s15 }
  0x14   : > { %p74_p6 = scmp.eq.s32.totalorder %s1113_s23, 0  ;;  %p189_p7 = scmp.eq.s32.totalorder %s1113_s23, 7 }
  0x15   : > { %s1427_s26 = smov (%p51_p4, %s1425_s26), 0  ;;  %p195_p10 = scmp.eq.s32.totalorder %s704_s24, 7 }
  0x16   : > { %1394 = sst [smem:[#allocation19_spill]] %s1427_s26  ;;  %p1137_p8 = por %p74_p6, %p73_p5 }
  0x17   : > { %p1141_p9 = por %p189_p7, %p67_p1  ;;  %s53_s6 = ssub.s32 %s1033_s21, %s1427_s26 }
  0x18   : > { %s1395_s30 = scalar_select %p1137_p8, 1, 0 }
  0x19   : > { %s1396_s5 = scalar_select %p1141_p9, 1, 0 }
  0x1a   : > { %s55_s7 = sor.u32 %s54_s28, %s53_s6  ;;  %p1147_p12 = por %p195_p10, %p73_p5 }
  0x1b   : > { %p58_p11 = scmp.eq.s32.totalorder %s55_s7, 0  ;;  %p767_p13 = scmp.lt.s32.totalorder %s1037_s22, 8 }
  0x1c   : > { %s1397_s8 = scalar_select %p1147_p12, 1, 0 }
  0x1d   : > { %s1378_s9 = sand.u32 1, %s1017_s17   ;;  %s709_s12 = sshll.u32 %s1033_s21, 2 }
  0x1e   : > { %1398 = sst [smem:[#allocation20_spill]] %s1397_s8  ;;  %s1158_s11 = sshll.u32 %s1378_s9, 3 }
  0x1f   : > { %s1154_s10 = scalar_select %p58_p11, %s1017_s17, %s60_s27  }
  0x20   : > { %s235_s13 = sadd.s32 %s1029_s20, %s709_s12  ;;  %p1164_p0 = pnand %p767_p13, %p1127_p3 }
  0x21   : > { %1399 = sst [smem:[#allocation21_spill]] %s1154_s10  ;;  %s1168_s24 = sshll.u32 %s235_s13, 7 }
  0x22   : > { %s1400_s14 = scalar_select %p1164_p0, 1, 0 }
  0x23   : > { %s246_s28 = sand.u32 1, %s1037_s22   ;;  %s1401_s1 = sld [smem:[#allocation22_spill]] }
  0x24   : > { %s250_s12 = scalar_lea.vmem [#allocation8], %s1158_s11  ;;  %s1182_s9 = scalar_lea.sflag [#allocation9], %s246_s28 }
  0x25   : > { %s260_s29 = sshll.u32 %s250_s12, 4  ;;  %p1188_p4 = pneg %p1164_p0  ;;  %s1179_s29 = int_to_ptr.vmem [resolvable:$true] %s260_s29 }
  0x29   : > { %s1175_s27 = scalar_lea.hbm %s1401_s1, %s1168_s24  ;;  %s850_s12 = scalar_lea.hbm %s1401_s1, 1024 }
  0x2a   : > { %s845_s13 = scalar_lea.hbm %s1175_s27, 128  ;;  %p851_p7 = scmp.lt.u32.totalorder %s1175_s27, %s1401_s1 }
  0x2b   : > { %p846_p3 = scmp.ne.s32.totalorder %s1175_s27, %s845_s13  ;;  %p852_p10 = scmp.lt.u32.totalorder %s850_s12, %s845_s13 }
  0x2c   : > { %p854_p13 = scmp.lt.u32.totalorder %s845_s13, %s1175_s27 }
  0x2d   : > { %p848_p5 = pnand %p1188_p4, %p846_p3  ;;  %p853_p11 = por %p852_p10, %p851_p7 }
  0x2f   : > { %p849_p6 = pneg %p848_p5  ;;  %p855_p1 = por %p854_p13, %p853_p11 }
  0x31   : > { %p856_p2 = pnand %p855_p1, %p849_p6 }
  0x33   : > { %859 = shalt.err (!%p856_p2)
}
  0x34   : > { %s860_s28 = scalar_lea.vmem %s1179_s29, 128  ;;  %s1039_s6 = smov [#allocation8]  }
  0x35   : > { %p861_p3 = scmp.ne.s32.totalorder %s1179_s29, %s860_s28  ;;  %s865_s7 = sshll.u32 %s1039_s6, 4  ;;  %s866_s7 = int_to_ptr.vmem [resolvable:$false] %s865_s7 }
  0x36   : > { %s867_s21 = scalar_lea.vmem %s866_s7, 256  ;;  %p868_p9 = scmp.lt.s32.totalorder %s1179_s29, %s866_s7 }
  0x37   : > { %p863_p5 = pnand %p861_p3, %p1188_p4  ;;  %p869_p8 = scmp.lt.s32.totalorder %s867_s21, %s860_s28 }
  0x39   : > { %p864_p12 = pneg %p863_p5  ;;  %p870_p7 = por %p869_p8, %p868_p9 }
  0x3b   : > { %p871_p10 = pnand %p870_p7, %p864_p12 }
  0x3d   : > { %874 = shalt.err (!%p871_p10)
}
  0x3e   : > { %759 = dma.hbm_to_vmem [thread:$0]  (!%p1164_p0), %s1175_s27, 128, %s1179_s29, %s1182_s9  }
  0x3f   : > { %p1403_p1 = scmp.lt.s32.totalorder %s1037_s22, 9  ;;  %p1404_p2 = scmp.ge.s32.totalorder %s1037_s22, 1 }
  0x40   : > { %s1224_s28 = scalar_lea.hbm %s1373_s0, %s1168_s24  ;;  %s229_s6 = scalar_lea.vmem [#allocation5], %s1158_s11 }
  0x41   : > { %p1216_p6 = pnand %p1404_p2, %p1403_p1  ;;  %s239_s7 = sshll.u32 %s229_s6, 4  ;;  %s1227_s7 = int_to_ptr.vmem [resolvable:$true] %s239_s7 }
  0x42   : > { %s1233_s21 = scalar_lea.hbm %s1375_s2, %s1168_s24  ;;  %s1406_s1 = sand.u32 1, %s1017_s17  }
  0x43   : > { %s1405_s25 = scalar_select %p1216_p6, 1, 0 }
  0x44   : > { %s226_s20 = scalar_lea.sflag [#allocation6], %s1406_s1  ;;  %s875_s10 = scalar_lea.hbm %s1224_s28, 128 }
  0x45   : > { %p876_p8 = scmp.ne.s32.totalorder %s1224_s28, %s875_s10  ;;  %s880_s8 = scalar_lea.hbm %s1373_s0, 1024 }
  0x46   : > { %p881_p11 = scmp.lt.u32.totalorder %s1224_s28, %s1373_s0  ;;  %p882_p13 = scmp.lt.u32.totalorder %s880_s8, %s875_s10 }
  0x47   : > { %p878_p9 = pnand %p876_p8, %p1188_p4  ;;  %p884_p5 = scmp.lt.u32.totalorder %s875_s10, %s1224_s28 }
  0x48   : > { %p883_p3 = por %p882_p13, %p881_p11 }
  0x49   : > { %p879_p12 = pneg %p878_p9 }
  0x4a   : > { %p885_p7 = por %p884_p5, %p883_p3 }
  0x4c   : > { %p886_p10 = pnand %p885_p7, %p879_p12 }
  0x4e   : > { %889 = shalt.err (!%p886_p10)
}
  0x4f   : > { %s890_s1 = scalar_lea.vmem %s1227_s7, 128  ;;  %s1040_s24 = smov [#allocation5]  }
  0x50   : > { %p891_p1 = scmp.ne.s32.totalorder %s1227_s7, %s890_s1  ;;  %s895_s27 = sshll.u32 %s1040_s24, 4  ;;  %s896_s27 = int_to_ptr.vmem [resolvable:$false] %s895_s27 }
  0x51   : > { %s897_s15 = scalar_lea.vmem %s896_s27, 256  ;;  %p898_p9 = scmp.lt.s32.totalorder %s1227_s7, %s896_s27 }
  0x52   : > { %p893_p2 = pnand %p891_p1, %p1188_p4  ;;  %p899_p6 = scmp.lt.s32.totalorder %s897_s15, %s890_s1 }
  0x54   : > { %p894_p8 = pneg %p893_p2  ;;  %p900_p11 = por %p899_p6, %p898_p9 }
  0x56   : > { %p901_p13 = pnand %p900_p11, %p894_p8 }
  0x58   : > { %904 = shalt.err (!%p901_p13)
}
  0x59   : > { %756 = dma.hbm_to_vmem [thread:$0]  (!%p1164_p0), %s1224_s28, 128, %s1227_s7, %s226_s20  }
  0x5a   : > { %s271_s8 = scalar_lea.vmem [#allocation10], %s1158_s11  ;;  %s905_s29 = scalar_lea.hbm %s1233_s21, 128 }
  0x5b   : > { %s281_s10 = sshll.u32 %s271_s8, 4  ;;  %p906_p12 = scmp.ne.s32.totalorder %s1233_s21, %s905_s29  ;;  %s282_s10 = int_to_ptr.vmem [resolvable:$true] %s281_s10 }
  0x5c   : > { %s910_s6 = scalar_lea.hbm %s1375_s2, 1024  ;;  %p911_p5 = scmp.lt.u32.totalorder %s1233_s21, %s1375_s2 }
  0x5d   : > { %p908_p6 = pnand %p906_p12, %p1188_p4  ;;  %p912_p7 = scmp.lt.u32.totalorder %s910_s6, %s905_s29 }
  0x5e   : > { %p914_p1 = scmp.lt.u32.totalorder %s905_s29, %s1233_s21 }
  0x5f   : > { %p909_p3 = pneg %p908_p6  ;;  %p913_p10 = por %p912_p7, %p911_p5 }
  0x61   : > { %p915_p2 = por %p914_p1, %p913_p10 }
  0x63   : > { %p916_p8 = pnand %p915_p2, %p909_p3 }
  0x65   : > { %919 = shalt.err (!%p916_p8)
}
  0x66   : > { %s920_s20 = scalar_lea.vmem %s282_s10, 128  ;;  %s1041_s11 = smov [#allocation10]  }
  0x67   : > { %p921_p9 = scmp.ne.s32.totalorder %s282_s10, %s920_s20  ;;  %s925_s28 = sshll.u32 %s1041_s11, 4  ;;  %s926_s28 = int_to_ptr.vmem [resolvable:$false] %s925_s28 }
  0x68   : > { %s927_s7 = scalar_lea.vmem %s926_s28, 256  ;;  %p928_p12 = scmp.lt.s32.totalorder %s282_s10, %s926_s28 }
  0x69   : > { %p923_p11 = pnand %p921_p9, %p1188_p4  ;;  %p929_p6 = scmp.lt.s32.totalorder %s927_s7, %s920_s20 }
  0x6b   : > { %p924_p13 = pneg %p923_p11  ;;  %p930_p0 = por %p929_p6, %p928_p12 }
  0x6d   : > { %p931_p5 = pnand %p930_p0, %p924_p13 }
  0x6f   : > { %934 = shalt.err (!%p931_p5)
}
  0x70   : > { %p1407_p7 = scmp.ne.s32.totalorder %s1400_s14, 0  ;;  %p1408_p3 = scmp.ne.s32.totalorder %s1405_s25, 0 }
  0x71   : > { %s1280_s26 = sand.u32 (!%p1408_p3), 1, %s1013_s16   ;;  %p1409_p0 = scmp.ne.s32.totalorder (!%p1408_p3), %s1395_s30, 0 }
  0x72   : > { %762 = dma.hbm_to_vmem [thread:$0]  (!%p1407_p7), %s1233_s21, 128, %s282_s10, %s1182_s9  }
  0x73   : > { %290 = sbr.rel (%p1408_p3) target bundleno = 946 (0x3b2), region = 36  ;;  %s1283_s27 = sshll.u32 (!%p1408_p3), %s1280_s26, 3 }
  0x74   : > { %s293_s15 = scalar_lea.sflag (!%p1408_p3), [#allocation6], %s1280_s26  ;;  %s296_s8 = scalar_lea.vmem (!%p1408_p3), [#allocation5], %s1283_s27 }
  0x7a   : > { %996 = dma.done.wait (%p1409_p0), %s293_s15, 128  }
  0x7b   : > { %998 = vsyncadd (%p1409_p0), %s293_s15, 4294967168  ;;  %s301_s9 = sand.u32 1, %s1113_s23   ;;  %s305_s25 = scalar_lea.vmem [#allocation8], %s1283_s27 }
  0x7c   : > { %s302_s14 = scalar_lea.sflag [#allocation9], %s301_s9 }
  0x7d   : > { %1000 = dma.done.wait (%p1409_p0), %s302_s14, 256  }
  0x7e   : > { %1002 = vsyncadd (%p1409_p0), %s302_s14, 4294967040  ;;  %vm371_vm0 = vcmask 261120   ;;  %v1042_v0 = vmov 0.0   ;;  %vm1043_vm1 = vmmov 0   ;;  %v376_v1 = vld [vmem:[%s305_s25] sm:$0xff]  ;;  %v373_v2 = vld [vmem:[%s296_s8] sm:$0xff] }
  0x7f   : > { %733 = vmatprep.subr.bf16.mxu0 %v1042_v0  ;;  %372 = vst.msk [vmem:[#allocation4] sm:$0xff] %vm371_vm0, %v1042_v0  ;;  %735 = vmatprep.mubr.msk.bf16.mxu0 %vm1043_vm1, %v1042_v0  ;;  %v377_v3 = vpack.c.bf16 %v376_v1, %v376_v1  ;;  %v374_v5 = vmul.f32 0.17677669, %v373_v2  ;;  %vm368_vm2 = vcmask 7168   ;;  %v1044_v7 = vmov -inf   ;;  %v427_v8 = vld [vmem:[%s1376_s3] sm:$0xff] }
  0x80   : > { %739 = vmatprep.subr.bf16.mxu1 %v1042_v0  ;;  %741 = vmatprep.mubr.msk.bf16.mxu1 %vm1043_vm1, %v1042_v0  ;;  %369 = vst.msk [vmem:[#allocation2] sm:$0xff] %vm368_vm2, %v1044_v7  ;;  %370 = vst.msk [vmem:[#allocation3] sm:$0xff] %vm368_vm2, %v1042_v0  ;;  %vm428_vm3 = vcmp.ne.s32.totalorder %v427_v8, 0  ;;  %vm431_vm4 = vcmask 64512   ;;  %v1045_v15 = vmov 0   ;;  %s314_s21 = scalar_lea.vmem [#allocation10], %s1283_s27 }
  0x81   : > { %v385_v4 = vsel %vm371_vm0, %v377_v3, 0  ;;  %v375_v6 = vpack.c.bf16 %v374_v5, %v374_v5  ;;  %837 = vset.pattern.permute.xlu0 %v1045_v15  ;;  %838 = vset.pattern.permute.xlu1 %v1045_v15  ;;  %v378_v20 = vld [vmem:[%s314_s21] sm:$0xff]  ;;  %vm466_vm5 = vcmask 1043456   ;;  %s725_s10 = sshll.u32 %s1025_s19, 2  ;;  %s355_s12 = scalar_lea.vmem [#allocation11], %s1283_s27 }
  0x82   : > { %734 = vmatpush3.bf16.xpose.msra.mxu0 %v385_v4  ;;  %v379_v21 = vpack.c.bf16 %v378_v20, %v378_v20  ;;  %s539_s29 = sadd.s32 %s1021_s18, %s725_s10  ;;  %s543_s6 = sshll.u32 %s355_s12, 4  ;;  %s1320_s6 = int_to_ptr.vmem [resolvable:$true] %s543_s6 }
  0x83   : > { %s726_s13 = sshll.u32 %s539_s29, 7  ;;  %s527_s19 = scalar_lea.sflag [#allocation7], %s1280_s26 }
  0x84   : > { %v468_v22 = vsel %vm466_vm5, %v379_v21, 0  ;;  %s1318_s20 = scalar_lea.hbm %s1377_s4, %s726_s13  ;;  %s935_s18 = scalar_lea.vmem %s1320_s6, 128 }
  0x85   : > { %740 = vmatpush3.bf16.msra.mxu1 %v468_v22  ;;  %p936_p4 = scmp.ne.s32.totalorder %s1320_s6, %s935_s18  ;;  %p1410_p10 = scmp.ne.s32.totalorder %s1396_s5, 0 }
  0x86   : > { %v455_v37 = vld [vmem:[#allocation4] sm:$0xff]  ;;  %s1046_s11 = smov [#allocation11]  }
  0x87   : > { %v430_v16 = vld [vmem:[#allocation2] sm:$0xff]  ;;  %v447_v31 = vld [vmem:[#allocation3] sm:$0xff]  ;;  %p937_p1 = pnand %p936_p4, %p1410_p10  ;;  %s939_s28 = sshll.u32 %s1046_s11, 4  ;;  %s940_s28 = int_to_ptr.vmem [resolvable:$false] %s939_s28 }
  0x88   : > { %s941_s7 = scalar_lea.vmem %s940_s28, 256  ;;  %p942_p8 = scmp.lt.s32.totalorder %s1320_s6, %s940_s28 }
  0x89   : > { %736 = vmatmul.mubr.msk.bf16.vlgmr.msra.gmra.mrb[0].mxu0 %vm371_vm0, %v375_v6  ;;  %p938_p2 = pneg %p937_p1  ;;  %p943_p9 = scmp.lt.s32.totalorder %s941_s7, %s935_s18 }
  0x8b   : > { %p944_p11 = por %p943_p9, %p942_p8 }
  0x8d   : > { %p945_p13 = pnand %p944_p11, %p938_p2 }
 0x15c   : > { %v421_v9 = vpop.f32.mrb[0].mxu0 }
 0x15d   : > { %v429_v10 = vsel %vm428_vm3, %v421_v9, -1e+30  ;;  %v737_v11 = vpop.f32.mrb[1].mxu0 }
 0x15e   : > { %v424_v12 = vpop.f32.mrb[2].mxu0  ;;  %v432_v13 = vsel %vm431_vm4, %v429_v10, -inf }
 0x15f   : > { %433 = vmax.xlane.f32.xlu0 %v432_v13  ;;  %v738_v14 = vpop.f32.mrb[3].mxu0 }
 0x1ec   : > { %v434_v17 = vpop.xlane.xlu0 %433 }
 0x1ed   : > { %v435_v18 = vmax.f32 %v430_v16, %v434_v17 }
 0x1ef   : > { %v436_v19 = vsub.f32 %v430_v16, %v435_v18  ;;  %512 = vst.msk [vmem:[#allocation2] sm:$0xff] %vm368_vm2, %v435_v18  ;;  %441 = vperm.xlu0 %837, %v435_v18  }
 0x1f1   : > { %v437_v29 = vmul.f32 1.442695, %v436_v19 }
 0x26e   : > { %v442_v23 = vpop.permute.xlu0 %441 }
 0x26f   : > { %v444_v24 = vsub.f32 %v429_v10, %v442_v23 }
 0x271   : > { %v445_v25 = vmul.f32 1.442695, %v444_v24 }
 0x273   : > { %839 = vpow2.f32 %v445_v25 }
 0x274   : > { %841 = vpow2.f32 %v437_v29 }
 0x27d   : > { %v840_v26 = vpop.eup %839 }
 0x27e   : > { %v449_v27 = vsel %vm431_vm4, %v840_v26, 0.0  ;;  %v462_v28 = vpack.c.bf16 %v840_v26, %v840_v26  ;;  %v842_v30 = vpop.eup %841 }
 0x27f   : > { %450 = vadd.xlane.f32.xlu1 %v449_v27  ;;  %v448_v32 = vmul.f32 %v842_v30, %v447_v31 }
 0x280   : > { %742 = vmatmul.mubr.msk.bf16.vlgmr.msra.gmra.mrb[0].mxu1 %vm431_vm4, %v462_v28 }
 0x290   : > { %458 = vperm.xlu1 %838, %v842_v30  }
 0x30c   : > { %v451_v33 = vpop.xlane.xlu1 %450 }
 0x30d   : > { %v452_v34 = vadd.f32 %v451_v33, %v448_v32 }
 0x30f   : > { %454 = vst.msk [vmem:[#allocation3] sm:$0xff] %vm368_vm2, %v452_v34 }
 0x310   : > { %v459_v38 = vpop.permute.xlu1 %458 }
 0x311   : > { %v461_v39 = vmul.f32 %v459_v38, %v455_v37 }
 0x316   : > { %v516_v35 = vld [vmem:[#allocation3] sm:$0xff] }
 0x317   : > { %843 = vrcp.f32 %v516_v35 }
 0x321   : > { %v844_v36 = vpop.eup %843 }
 0x322   : > { %521 = vperm.xlu1 %838, %v844_v36  }
 0x353   : > { %v504_v40 = vpop.f32.mrb[0].mxu1 }
 0x354   : > { %v510_v41 = vadd.f32 %v504_v40, %v461_v39  ;;  %v743_v42 = vpop.f32.mrb[1].mxu1 }
 0x355   : > { %v507_v43 = vpop.f32.mrb[2].mxu1 }
 0x356   : > { %511 = vst.msk [vmem:[#allocation4] sm:$0xff] %vm371_vm0, %v510_v41  ;;  %v744_v44 = vpop.f32.mrb[3].mxu1 }
 0x35d   : > { %v518_v45 = vld [vmem:[#allocation4] sm:$0xff] }
 0x3a1   : > { %v522_v46 = vpop.permute.xlu1 %521 }
 0x3a2   : > { %v524_v47 = vmul.f32 %v522_v46, %v518_v45 }
 0x3a4   : > { %525 = vst.msk [vmem:[%s355_s12] sm:$0xff] %vm371_vm0, %v524_v47 }
 0x3a5   : > { %948 = shalt.err (!%p945_p13)
}
 0x3a6   : > { %s949_s26 = scalar_lea.hbm %s1318_s20, 128  ;;  %s953_s8 = scalar_lea.hbm %s1377_s4, 1024 }
 0x3a7   : > { %p950_p12 = scmp.ne.s32.totalorder %s1318_s20, %s949_s26  ;;  %p954_p7 = scmp.lt.u32.totalorder %s1318_s20, %s1377_s4 }
 0x3a8   : > { %p955_p3 = scmp.lt.u32.totalorder %s953_s8, %s949_s26  ;;  %p957_p4 = scmp.lt.u32.totalorder %s949_s26, %s1318_s20 }
 0x3a9   : > { %p951_p6 = pnand %p950_p12, %p1410_p10 }
 0x3aa   : > { %p956_p0 = por %p955_p3, %p954_p7 }
 0x3ab   : > { %p952_p5 = pneg %p951_p6 }
 0x3ac   : > { %p958_p1 = por %p957_p4, %p956_p0 }
 0x3ae   : > { %p959_p2 = pnand %p958_p1, %p952_p5 }
 0x3b0   : > { %962 = shalt.err (!%p959_p2)
}
 0x3b1   : > { %751 = dma.vmem_to_hbm [thread:$0]  (%p1410_p10), %s1320_s6, 128, %s1318_s20, %s527_s19  }
 0x3b2 PF: > { %s1411_s25 = sld [smem:[#allocation15_spill]]  ;;  %s1412_s23 = sld [smem:[#allocation20_spill]] }
 0x3b3   : > { %p768_p8 = scmp.ge.s32.totalorder %s1037_s22, 2 }
 0x3b8   : > { %s555_s30 = sand.u32 1, %s1411_s25   ;;  %p1413_p9 = scmp.ne.s32.totalorder %s1412_s23, 0 }
 0x3b9   : > { %s556_s21 = scalar_lea.sflag [#allocation7], %s555_s30 }
 0x3ba   : > { %p764_p11 = pnand %p768_p8, %p1413_p9 }
 0x3bc   : > { %1004 = dma.done.wait (!%p764_p11), %s556_s21, 128  }
 0x3bd   : > { %1006 = vsyncadd (!%p764_p11), %s556_s21, 4294967168  ;;  %s23_s22 = sadd.s32 1, %s1037_s22   ;;  %s1414_s5 = sld [smem:[#allocation21_spill]] }
 0x3be   : > { %p20_p13 = scmp.ge.s32.totalorder %s23_s22, 10   ;;  %s1415_s18 = sld [smem:[#allocation16_spill]] }
 0x3bf   : > { %s1416_s19 = sld [smem:[#allocation17_spill]]  ;;  %s1417_s20 = sld [smem:[#allocation18_spill]] }
 0x3c0   : > { %s1418_s21 = sld [smem:[#allocation19_spill]]  ;;  %s1419_s15 = smov %s1013_s16 }
 0x3c1   : > { %s1420_s16 = smov %s1017_s17  ;;  %22 = sbr.rel (!%p20_p13) target bundleno = 11 (0xb), region = 116 }
 0x3c3   : > { %s1421_s17 = smov %s1414_s5 }
 0x3c8   :  { %561 = vsyncpa [#allocation6], 1 }
 0x3c9   :  { %563 = vsyncpa [#allocation6 + $0x1], 1 }
 0x3ca   :  { %564 = vsyncpa [#allocation9], 1 }
 0x3cb   :  { %566 = vsyncpa [#allocation9 + $0x1], 1 }
 0x3cc   :  { %567 = vsyncpa [#allocation7], 1 }
 0x3cd   :  { %569 = vsyncpa [#allocation7 + $0x1], 1 }

</bundles_post_ra>
